<compile_context>
chip_gen: v6e
topology: v6e:2x2x1
jax: 0.10.0
libtpu: 0.0.40
codegen_flags: <defaults>
</compile_context>

<pallas_src>
import functools

import jax
import jax.numpy as jnp
import numpy as np
from jax import lax
from jax.experimental import pallas as pl
from jax.experimental.pallas import tpu as pltpu


def _round_up(a, m):
    return (a + m - 1) // m * m


def _conv_block_kernel(x_ref, w1_ref, b1_ref, w2_ref, b2_ref, wd_ref, bd_ref,
                       o_ref, *, kernel_size, pad, logical_len, seg_len,
                       batch_tile):
    """One batch tile per grid step.

    x_ref : (batch_tile, C_in, seg_len)  f32
    w1_ref: (K, C_int, C_in)  bf16     b1_ref: (C_int, 1) f32
    w2_ref: (K, C_out, C_int) bf16     b2_ref: (C_out, 1) f32
    wd_ref: (C_out, C_in)     bf16     bd_ref: (C_out, 1) f32
    o_ref : (batch_tile, C_out, seg_len)
    """
    K = kernel_size
    width = batch_tile * seg_len

    # --- all batch elements of this tile side by side along lanes -----------
    if batch_tile == 1:
        x32 = x_ref[0]                                        # (C_in, W) f32
    else:
        # lane-axis concat of 128-multiples: cheap block placement
        x32 = jnp.concatenate([x_ref[b] for b in range(batch_tile)], axis=-1)
    x_bf = x32.astype(jnp.bfloat16)

    # --- hoisted per-tap validity masks (shared by conv1/conv2/all batches) -
    lane = lax.broadcasted_iota(jnp.int32, (1, width), 1)
    l_in = lane % seg_len if batch_tile > 1 else lane         # in-segment pos
    masks = [None] * K
    for k in range(K):
        d = k - pad
        if d != 0:
            masks[k] = jnp.logical_and(l_in + d >= 0, l_in + d < logical_len)

    def taps(v32, v_bf):
        """bf16 tap views: tap[k][c, l] = v[c, l + k - pad] (0 outside range).

        Shifts use pltpu.roll (XLU lane rotation, f32) then cast to bf16 and
        mask with the hoisted lane masks, so no padded copy of v and no
        sublane concat is ever materialized; cross-batch-segment wraparound
        lanes are exactly the masked ones.
        """
        out = []
        for k in range(K):
            d = k - pad
            if d == 0:
                out.append(v_bf)
            else:
                r = pltpu.roll(v32, shift=(-d) % width, axis=1)
                out.append(jnp.where(masks[k], r.astype(jnp.bfloat16),
                                     jnp.bfloat16(0)))
        return out

    def conv(tap_list, w_ref, bias):
        # K accumulating matmuls into one f32 accumulator over a >=256-lane RHS.
        acc = bias                                            # (C, 1) -> bcast
        for k in range(K):
            acc = acc + jnp.dot(w_ref[k], tap_list[k],
                                preferred_element_type=jnp.float32)
        return acc                                            # (C, W) f32

    # ---- conv1 -> relu (dropout1 = identity in eval) ------------------------
    h32 = jnp.maximum(conv(taps(x32, x_bf), w1_ref, b1_ref[...]), 0.0)

    # ---- conv2 -> relu (dropout2 = identity in eval) ------------------------
    out = jnp.maximum(conv(taps(h32, h32.astype(jnp.bfloat16)),
                           w2_ref, b2_ref[...]), 0.0)

    # ---- residual branch: 1x1 downsample conv on the raw input -------------
    res = jnp.dot(wd_ref[...], x_bf, preferred_element_type=jnp.float32) \
        + bd_ref[...]

    y = jnp.maximum(out + res, 0.0).astype(o_ref.dtype)

    if batch_tile == 1:
        o_ref[0] = y                                          # one wide store
    else:
        for b in range(batch_tile):                           # 128-aligned lane slices
            o_ref[b] = y[:, b * seg_len:(b + 1) * seg_len]


def _vmem_limit_bytes():
    """Generation-aware scoped-VMEM limit: ~half of the core's VMEM
    (=> ~64 MiB on v5e/v6e's 128 MiB, ~32 MiB on v7x's 64 MiB)."""
    try:
        cap = int(pltpu.get_tpu_info().vmem_capacity_bytes)
    except Exception:
        cap = 64 * 1024 * 1024
    return int(min(max(cap // 2, 32 * 1024 * 1024), 96 * 1024 * 1024))


def _pick_batch_tile(N, C_in, C_out, Lp, in_itemsize, out_itemsize,
                     budget_bytes=24 * 1024 * 1024):
    """Default batch tile.

    Keep >= 2 grid steps (v7x megacore sharding + software pipelining) and
    only widen the matmul RHS toward >= 256 lanes within an explicit VMEM
    budget for the double-buffered input+output blocks.
    """
    per_b = 2 * Lp * (C_in * in_itemsize + C_out * out_itemsize)  # x2: dbl-buf
    max_bt = max(1, budget_bytes // max(per_b, 1))
    bt = 1
    while (bt * Lp < 256 and bt * 2 <= max_bt
           and N % (bt * 2) == 0 and N // (bt * 2) >= 2):
        bt *= 2
    return bt


def conv_block_forward(x, params, kernel_size, *, batch_tile=None,
                       out_dtype=None):
    """x: (N, C_in, L) float32. Returns (N, C_out, L) in out_dtype (def: x.dtype)."""
    w1, b1, w2, b2, wd, bd = params   # PyTorch layout: w (C_out, C_in, K), b (C_out,)
    # Even K breaks the residual add in the reference module itself.
    assert kernel_size % 2 == 1, "ConvBlock requires odd kernel_size"
    N, C_in, L = x.shape
    pad = (kernel_size - 1) // 2
    C_int, C_out = w1.shape[0], w2.shape[0]
    out_dtype = jnp.dtype(out_dtype) if out_dtype is not None else x.dtype

    # Lanes must be 128-aligned.  When L already is (the common case) there is
    # NO HBM-side pad of x and NO output slice; channels stay unpadded because
    # block dim == full array extent is allowed for the activation BlockSpecs.
    Lp = _round_up(L, 128)
    x_in = x if Lp == L else jnp.pad(x, ((0, 0), (0, 0), (0, Lp - L)))

    # Tiny weights, reshaped once in the wrapper: (C_out, C_in, K) -> (K, C_out, C_in)
    def prep_w(w):
        return jnp.transpose(w, (2, 0, 1)).astype(jnp.bfloat16)

    w1t = prep_w(w1)                                  # (K, C_int, C_in)  bf16
    w2t = prep_w(w2)                                  # (K, C_out, C_int) bf16
    wdt = wd[:, :, 0].astype(jnp.bfloat16)            # (C_out, C_in)     bf16
    b1c = b1.reshape(-1, 1).astype(jnp.float32)       # (C_int, 1)
    b2c = b2.reshape(-1, 1).astype(jnp.float32)       # (C_out, 1)
    bdc = bd.reshape(-1, 1).astype(jnp.float32)       # (C_out, 1)

    if batch_tile is None:
        batch_tile = _pick_batch_tile(N, C_in, C_out, Lp,
                                      x.dtype.itemsize, out_dtype.itemsize)
    assert N % batch_tile == 0, (N, batch_tile)

    kernel = functools.partial(
        _conv_block_kernel, kernel_size=kernel_size, pad=pad,
        logical_len=L, seg_len=Lp, batch_tile=batch_tile)

    def full_spec(arr):
        nd = arr.ndim
        return pl.BlockSpec(arr.shape, lambda n, _nd=nd: (0,) * _nd)

    out = pl.pallas_call(
        kernel,
        out_shape=jax.ShapeDtypeStruct((N, C_out, Lp), out_dtype),
        grid=(N // batch_tile,),
        in_specs=[
            pl.BlockSpec((batch_tile, C_in, Lp), lambda n: (n, 0, 0)),
            full_spec(w1t), full_spec(b1c),
            full_spec(w2t), full_spec(b2c),
            full_spec(wdt), full_spec(bdc),
        ],
        out_specs=pl.BlockSpec((batch_tile, C_out, Lp), lambda n: (n, 0, 0)),
        compiler_params=pltpu.CompilerParams(
            dimension_semantics=("parallel",),
            vmem_limit_bytes=_vmem_limit_bytes()),
    )(x_in, w1t, b1c, w2t, b2c, wdt, bdc)

    return out if Lp == L else out[:, :, :L]


def init_params(key, n_in, n_int, n_out, kernel_size):
    """Deterministic synthetic parameters (weight_norm: W = g * v / ||v||)."""
    ks = jax.random.split(key, 8)

    def wn_weight(kv, kg, shape):
        v = 0.01 * jax.random.normal(kv, shape, jnp.float32)        # .normal_(0, 0.01)
        g = 0.5 + jax.random.uniform(kg, (shape[0],), jnp.float32)  # per-out-channel gain
        norm = jnp.sqrt(jnp.sum(v * v, axis=(1, 2), keepdims=True))
        return g[:, None, None] * v / norm

    w1 = wn_weight(ks[0], ks[1], (n_int, n_in, kernel_size))
    w2 = wn_weight(ks[2], ks[3], (n_out, n_int, kernel_size))
    wd = 0.01 * jax.random.normal(ks[4], (n_out, n_in, 1), jnp.float32)
    b1 = 0.1 * jax.random.normal(ks[5], (n_int,), jnp.float32)
    b2 = 0.1 * jax.random.normal(ks[6], (n_out,), jnp.float32)
    bd = 0.1 * jax.random.normal(ks[7], (n_out,), jnp.float32)
    return w1, b1, w2, b2, wd, bd


def ref_forward(x, params, kernel_size):
    """Pure-JAX reference using the same bf16-input / f32-accumulate matmuls."""
    w1, b1, w2, b2, wd, bd = params
    pad = (kernel_size - 1) // 2

    def conv1d(inp, w, p):
        wb = w.astype(jnp.bfloat16)
        dn = lax.conv_dimension_numbers(inp.shape, wb.shape, ('NCH', 'OIH', 'NCH'))
        return lax.conv_general_dilated(inp, wb, (1,), [(p, p)],
                                        dimension_numbers=dn,
                                        preferred_element_type=jnp.float32)

    xb = x.astype(jnp.bfloat16)
    h = jnp.maximum(conv1d(xb, w1, pad) + b1[None, :, None], 0.0)
    o = jnp.maximum(conv1d(h.astype(jnp.bfloat16), w2, pad) + b2[None, :, None], 0.0)
    r = conv1d(xb, wd, 0) + bd[None, :, None]
    return jnp.maximum(o + r, 0.0)


if __name__ == "__main__":
    # n_in != n_out -> the 1x1 downsample branch exists, as in the module.
    # L = 256: lanes stay dense with NO pad/slice, each grid step's matmul RHS
    # is 256 lanes wide (fills v6e/v7x's 256-wide MXU), and the batch axis
    # still provides 2 grid steps for pipelining / v7x megacore.
    N, n_in, n_int, n_out, K, L = 2, 4, 8, 8, 3, 256

    key = jax.random.PRNGKey(0)
    kx, kp = jax.random.split(key)
    x = jax.random.normal(kx, (N, n_in, L), jnp.float32)
    params = init_params(kp, n_in, n_int, n_out, K)

    out = conv_block_forward(x, params, K)
    out = jax.block_until_ready(out)

    ref = ref_forward(x, params, K)
    assert out.shape == (N, n_out, L), out.shape
    np.testing.assert_allclose(np.asarray(out), np.asarray(ref),
                               rtol=1e-3, atol=1e-3)
    print("KERNEL_OK")
</pallas_src>

<mosaic_0001>
module attributes {stable_mosaic.version = 11 : i64} {
  func.func @_conv_block_kernel(%arg0: i32, %arg1: memref<1x4x256xf32, #tpu.memory_space<vmem>>, %arg2: memref<3x8x4xbf16, #tpu.memory_space<vmem>>, %arg3: memref<8x1xf32, #tpu.memory_space<vmem>>, %arg4: memref<3x8x8xbf16, #tpu.memory_space<vmem>>, %arg5: memref<8x1xf32, #tpu.memory_space<vmem>>, %arg6: memref<8x4xbf16, #tpu.memory_space<vmem>>, %arg7: memref<8x1xf32, #tpu.memory_space<vmem>>, %arg8: memref<1x8x256xf32, #tpu.memory_space<vmem>>) attributes {dimension_semantics = [#tpu.dimension_semantics<parallel>], iteration_bounds = array<i64: 2>, scalar_prefetch = 0 : i64, scratch_operands = 0 : i64, tpu.core_type = #tpu.core_type<tc>, window_params = [{transform_indices = @transform_0, window_bounds = array<i64: 1, 4, 256>}, {pipeline_mode = #tpu.pipeline_mode<synchronous>, transform_indices = @transform_1, window_bounds = array<i64: 3, 8, 4>}, {pipeline_mode = #tpu.pipeline_mode<synchronous>, transform_indices = @transform_2, window_bounds = array<i64: 8, 1>}, {pipeline_mode = #tpu.pipeline_mode<synchronous>, transform_indices = @transform_3, window_bounds = array<i64: 3, 8, 8>}, {pipeline_mode = #tpu.pipeline_mode<synchronous>, transform_indices = @transform_4, window_bounds = array<i64: 8, 1>}, {pipeline_mode = #tpu.pipeline_mode<synchronous>, transform_indices = @transform_5, window_bounds = array<i64: 8, 4>}, {pipeline_mode = #tpu.pipeline_mode<synchronous>, transform_indices = @transform_6, window_bounds = array<i64: 8, 1>}, {transform_indices = @transform_7, window_bounds = array<i64: 1, 8, 256>}]} {
    %c0 = arith.constant 0 : index
    %c0_0 = arith.constant 0 : index
    %c0_1 = arith.constant 0 : index
    %0 = vector.load %arg1[%c0, %c0_0, %c0_1] : memref<1x4x256xf32, #tpu.memory_space<vmem>>, vector<1x4x256xf32>
    %1 = vector.shape_cast %0 : vector<1x4x256xf32> to vector<4x256xf32>
    %2 = arith.truncf %1 : vector<4x256xf32> to vector<4x256xbf16>
    %3 = tpu.iota {dimensions = array<i32: 1>} : vector<1x256xi32>
    %c-1_i32 = arith.constant -1 : i32
    %4 = vector.broadcast %c-1_i32 : i32 to vector<1x256xi32>
    %5 = arith.addi %3, %4 : vector<1x256xi32>
    %c0_i32 = arith.constant 0 : i32
    %6 = vector.broadcast %c0_i32 : i32 to vector<1x256xi32>
    %7 = arith.cmpi sge, %5, %6 : vector<1x256xi32>
    %c-1_i32_2 = arith.constant -1 : i32
    %8 = vector.broadcast %c-1_i32_2 : i32 to vector<1x256xi32>
    %9 = arith.addi %3, %8 : vector<1x256xi32>
    %c256_i32 = arith.constant 256 : i32
    %10 = vector.broadcast %c256_i32 : i32 to vector<1x256xi32>
    %11 = arith.cmpi slt, %9, %10 : vector<1x256xi32>
    %12 = arith.andi %7, %11 : vector<1x256xi1>
    %c1_i32 = arith.constant 1 : i32
    %13 = vector.broadcast %c1_i32 : i32 to vector<1x256xi32>
    %14 = arith.addi %3, %13 : vector<1x256xi32>
    %c0_i32_3 = arith.constant 0 : i32
    %15 = vector.broadcast %c0_i32_3 : i32 to vector<1x256xi32>
    %16 = arith.cmpi sge, %14, %15 : vector<1x256xi32>
    %c1_i32_4 = arith.constant 1 : i32
    %17 = vector.broadcast %c1_i32_4 : i32 to vector<1x256xi32>
    %18 = arith.addi %3, %17 : vector<1x256xi32>
    %c256_i32_5 = arith.constant 256 : i32
    %19 = vector.broadcast %c256_i32_5 : i32 to vector<1x256xi32>
    %20 = arith.cmpi slt, %18, %19 : vector<1x256xi32>
    %21 = arith.andi %16, %20 : vector<1x256xi1>
    %c1_i32_6 = arith.constant 1 : i32
    %22 = tpu.dynamic_rotate %1 by %c1_i32_6 dim 1 : vector<4x256xf32>, i32 -> vector<4x256xf32>
    %23 = arith.truncf %22 : vector<4x256xf32> to vector<4x256xbf16>
    %cst = arith.constant 0.000000e+00 : bf16
    %24 = vector.shape_cast %12 : vector<1x256xi1> to vector<1x256xi1>
    %25 = vector.broadcast %24 : vector<1x256xi1> to vector<4x256xi1>
    %26 = vector.broadcast %cst : bf16 to vector<4x256xbf16>
    %27 = arith.select %25, %23, %26 : vector<4x256xi1>, vector<4x256xbf16>
    %c255_i32 = arith.constant 255 : i32
    %28 = tpu.dynamic_rotate %1 by %c255_i32 dim 1 : vector<4x256xf32>, i32 -> vector<4x256xf32>
    %29 = arith.truncf %28 : vector<4x256xf32> to vector<4x256xbf16>
    %cst_7 = arith.constant 0.000000e+00 : bf16
    %30 = vector.shape_cast %21 : vector<1x256xi1> to vector<1x256xi1>
    %31 = vector.broadcast %30 : vector<1x256xi1> to vector<4x256xi1>
    %32 = vector.broadcast %cst_7 : bf16 to vector<4x256xbf16>
    %33 = arith.select %31, %29, %32 : vector<4x256xi1>, vector<4x256xbf16>
    %c0_8 = arith.constant 0 : index
    %c0_9 = arith.constant 0 : index
    %34 = vector.load %arg3[%c0_8, %c0_9] : memref<8x1xf32, #tpu.memory_space<vmem>>, vector<8x1xf32>
    %c0_10 = arith.constant 0 : index
    %c0_11 = arith.constant 0 : index
    %c0_12 = arith.constant 0 : index
    %35 = vector.load %arg2[%c0_10, %c0_11, %c0_12] : memref<3x8x4xbf16, #tpu.memory_space<vmem>>, vector<1x8x4xbf16>
    %36 = vector.shape_cast %35 : vector<1x8x4xbf16> to vector<8x4xbf16>
    %cst_13 = arith.constant dense<0.000000e+00> : vector<8x256xf32>
    %37 = tpu.matmul %36, %27, %cst_13 {dimension_numbers = #tpu.dot_dimension_numbers<[1], [0], [0], [1], [0, 0, 1, 1], [], []>} : vector<8x4xbf16>, vector<4x256xbf16>, vector<8x256xf32> -> vector<8x256xf32>
    %38 = vector.broadcast %34 : vector<8x1xf32> to vector<8x256xf32>
    %39 = arith.addf %38, %37 : vector<8x256xf32>
    %c1 = arith.constant 1 : index
    %c0_14 = arith.constant 0 : index
    %c0_15 = arith.constant 0 : index
    %40 = vector.load %arg2[%c1, %c0_14, %c0_15] : memref<3x8x4xbf16, #tpu.memory_space<vmem>>, vector<1x8x4xbf16>
    %41 = vector.shape_cast %40 : vector<1x8x4xbf16> to vector<8x4xbf16>
    %cst_16 = arith.constant dense<0.000000e+00> : vector<8x256xf32>
    %42 = tpu.matmul %41, %2, %cst_16 {dimension_numbers = #tpu.dot_dimension_numbers<[1], [0], [0], [1], [0, 0, 1, 1], [], []>} : vector<8x4xbf16>, vector<4x256xbf16>, vector<8x256xf32> -> vector<8x256xf32>
    %43 = arith.addf %39, %42 : vector<8x256xf32>
    %c2 = arith.constant 2 : index
    %c0_17 = arith.constant 0 : index
    %c0_18 = arith.constant 0 : index
    %44 = vector.load %arg2[%c2, %c0_17, %c0_18] : memref<3x8x4xbf16, #tpu.memory_space<vmem>>, vector<1x8x4xbf16>
    %45 = vector.shape_cast %44 : vector<1x8x4xbf16> to vector<8x4xbf16>
    %cst_19 = arith.constant dense<0.000000e+00> : vector<8x256xf32>
    %46 = tpu.matmul %45, %33, %cst_19 {dimension_numbers = #tpu.dot_dimension_numbers<[1], [0], [0], [1], [0, 0, 1, 1], [], []>} : vector<8x4xbf16>, vector<4x256xbf16>, vector<8x256xf32> -> vector<8x256xf32>
    %47 = arith.addf %43, %46 : vector<8x256xf32>
    %cst_20 = arith.constant 0.000000e+00 : f32
    %48 = vector.broadcast %cst_20 : f32 to vector<8x256xf32>
    %49 = arith.maximumf %47, %48 : vector<8x256xf32>
    %50 = arith.truncf %49 : vector<8x256xf32> to vector<8x256xbf16>
    %c1_i32_21 = arith.constant 1 : i32
    %51 = tpu.dynamic_rotate %49 by %c1_i32_21 dim 1 : vector<8x256xf32>, i32 -> vector<8x256xf32>
    %52 = arith.truncf %51 : vector<8x256xf32> to vector<8x256xbf16>
    %cst_22 = arith.constant 0.000000e+00 : bf16
    %53 = vector.shape_cast %12 : vector<1x256xi1> to vector<1x256xi1>
    %54 = vector.broadcast %53 : vector<1x256xi1> to vector<8x256xi1>
    %55 = vector.broadcast %cst_22 : bf16 to vector<8x256xbf16>
    %56 = arith.select %54, %52, %55 : vector<8x256xi1>, vector<8x256xbf16>
    %c255_i32_23 = arith.constant 255 : i32
    %57 = tpu.dynamic_rotate %49 by %c255_i32_23 dim 1 : vector<8x256xf32>, i32 -> vector<8x256xf32>
    %58 = arith.truncf %57 : vector<8x256xf32> to vector<8x256xbf16>
    %cst_24 = arith.constant 0.000000e+00 : bf16
    %59 = vector.shape_cast %21 : vector<1x256xi1> to vector<1x256xi1>
    %60 = vector.broadcast %59 : vector<1x256xi1> to vector<8x256xi1>
    %61 = vector.broadcast %cst_24 : bf16 to vector<8x256xbf16>
    %62 = arith.select %60, %58, %61 : vector<8x256xi1>, vector<8x256xbf16>
    %c0_25 = arith.constant 0 : index
    %c0_26 = arith.constant 0 : index
    %63 = vector.load %arg5[%c0_25, %c0_26] : memref<8x1xf32, #tpu.memory_space<vmem>>, vector<8x1xf32>
    %c0_27 = arith.constant 0 : index
    %c0_28 = arith.constant 0 : index
    %c0_29 = arith.constant 0 : index
    %64 = vector.load %arg4[%c0_27, %c0_28, %c0_29] : memref<3x8x8xbf16, #tpu.memory_space<vmem>>, vector<1x8x8xbf16>
    %65 = vector.shape_cast %64 : vector<1x8x8xbf16> to vector<8x8xbf16>
    %cst_30 = arith.constant dense<0.000000e+00> : vector<8x256xf32>
    %66 = tpu.matmul %65, %56, %cst_30 {dimension_numbers = #tpu.dot_dimension_numbers<[1], [0], [0], [1], [0, 0, 1, 1], [], []>} : vector<8x8xbf16>, vector<8x256xbf16>, vector<8x256xf32> -> vector<8x256xf32>
    %67 = vector.broadcast %63 : vector<8x1xf32> to vector<8x256xf32>
    %68 = arith.addf %67, %66 : vector<8x256xf32>
    %c1_31 = arith.constant 1 : index
    %c0_32 = arith.constant 0 : index
    %c0_33 = arith.constant 0 : index
    %69 = vector.load %arg4[%c1_31, %c0_32, %c0_33] : memref<3x8x8xbf16, #tpu.memory_space<vmem>>, vector<1x8x8xbf16>
    %70 = vector.shape_cast %69 : vector<1x8x8xbf16> to vector<8x8xbf16>
    %cst_34 = arith.constant dense<0.000000e+00> : vector<8x256xf32>
    %71 = tpu.matmul %70, %50, %cst_34 {dimension_numbers = #tpu.dot_dimension_numbers<[1], [0], [0], [1], [0, 0, 1, 1], [], []>} : vector<8x8xbf16>, vector<8x256xbf16>, vector<8x256xf32> -> vector<8x256xf32>
    %72 = arith.addf %68, %71 : vector<8x256xf32>
    %c2_35 = arith.constant 2 : index
    %c0_36 = arith.constant 0 : index
    %c0_37 = arith.constant 0 : index
    %73 = vector.load %arg4[%c2_35, %c0_36, %c0_37] : memref<3x8x8xbf16, #tpu.memory_space<vmem>>, vector<1x8x8xbf16>
    %74 = vector.shape_cast %73 : vector<1x8x8xbf16> to vector<8x8xbf16>
    %cst_38 = arith.constant dense<0.000000e+00> : vector<8x256xf32>
    %75 = tpu.matmul %74, %62, %cst_38 {dimension_numbers = #tpu.dot_dimension_numbers<[1], [0], [0], [1], [0, 0, 1, 1], [], []>} : vector<8x8xbf16>, vector<8x256xbf16>, vector<8x256xf32> -> vector<8x256xf32>
    %76 = arith.addf %72, %75 : vector<8x256xf32>
    %cst_39 = arith.constant 0.000000e+00 : f32
    %77 = vector.broadcast %cst_39 : f32 to vector<8x256xf32>
    %78 = arith.maximumf %76, %77 : vector<8x256xf32>
    %c0_40 = arith.constant 0 : index
    %c0_41 = arith.constant 0 : index
    %79 = vector.load %arg6[%c0_40, %c0_41] : memref<8x4xbf16, #tpu.memory_space<vmem>>, vector<8x4xbf16>
    %cst_42 = arith.constant dense<0.000000e+00> : vector<8x256xf32>
    %80 = tpu.matmul %79, %2, %cst_42 {dimension_numbers = #tpu.dot_dimension_numbers<[1], [0], [0], [1], [0, 0, 1, 1], [], []>} : vector<8x4xbf16>, vector<4x256xbf16>, vector<8x256xf32> -> vector<8x256xf32>
    %c0_43 = arith.constant 0 : index
    %c0_44 = arith.constant 0 : index
    %81 = vector.load %arg7[%c0_43, %c0_44] : memref<8x1xf32, #tpu.memory_space<vmem>>, vector<8x1xf32>
    %82 = vector.broadcast %81 : vector<8x1xf32> to vector<8x256xf32>
    %83 = arith.addf %80, %82 : vector<8x256xf32>
    %84 = arith.addf %78, %83 : vector<8x256xf32>
    %cst_45 = arith.constant 0.000000e+00 : f32
    %85 = vector.broadcast %cst_45 : f32 to vector<8x256xf32>
    %86 = arith.maximumf %84, %85 : vector<8x256xf32>
    %c0_46 = arith.constant 0 : index
    %c0_47 = arith.constant 0 : index
    %c0_48 = arith.constant 0 : index
    %87 = vector.load %arg8[%c0_46, %c0_47, %c0_48] : memref<1x8x256xf32, #tpu.memory_space<vmem>>, vector<1x8x256xf32>
    %88 = vector.shape_cast %87 : vector<1x8x256xf32> to vector<8x256xf32>
    %89 = vector.shape_cast %86 : vector<8x256xf32> to vector<1x8x256xf32>
    tpu.vector_store %arg8[%c0_46, %c0_47, %c0_48], %89 {strides = array<i32>} : memref<1x8x256xf32, #tpu.memory_space<vmem>>, vector<1x8x256xf32>,
    return
  }
  func.func @transform_0(%arg0: i32) -> (i32, i32, i32) {
    %c0_i32 = arith.constant 0 : i32
    %c0_i32_0 = arith.constant 0 : i32
    %c0_i32_1 = arith.constant 0 : i32
    return %arg0, %c0_i32, %c0_i32_0 : i32, i32, i32
  }
  func.func @transform_1(%arg0: i32) -> (i32, i32, i32) {
    %c0_i32 = arith.constant 0 : i32
    %c0_i32_0 = arith.constant 0 : i32
    %c0_i32_1 = arith.constant 0 : i32
    %c0_i32_2 = arith.constant 0 : i32
    return %c0_i32, %c0_i32_0, %c0_i32_1 : i32, i32, i32
  }
  func.func @transform_2(%arg0: i32) -> (i32, i32) {
    %c0_i32 = arith.constant 0 : i32
    %c0_i32_0 = arith.constant 0 : i32
    %c0_i32_1 = arith.constant 0 : i32
    return %c0_i32, %c0_i32_0 : i32, i32
  }
  func.func @transform_3(%arg0: i32) -> (i32, i32, i32) {
    %c0_i32 = arith.constant 0 : i32
    %c0_i32_0 = arith.constant 0 : i32
    %c0_i32_1 = arith.constant 0 : i32
    %c0_i32_2 = arith.constant 0 : i32
    return %c0_i32, %c0_i32_0, %c0_i32_1 : i32, i32, i32
  }
  func.func @transform_4(%arg0: i32) -> (i32, i32) {
    %c0_i32 = arith.constant 0 : i32
    %c0_i32_0 = arith.constant 0 : i32
    %c0_i32_1 = arith.constant 0 : i32
    return %c0_i32, %c0_i32_0 : i32, i32
  }
  func.func @transform_5(%arg0: i32) -> (i32, i32) {
    %c0_i32 = arith.constant 0 : i32
    %c0_i32_0 = arith.constant 0 : i32
    %c0_i32_1 = arith.constant 0 : i32
    return %c0_i32, %c0_i32_0 : i32, i32
  }
  func.func @transform_6(%arg0: i32) -> (i32, i32) {
    %c0_i32 = arith.constant 0 : i32
    %c0_i32_0 = arith.constant 0 : i32
    %c0_i32_1 = arith.constant 0 : i32
    return %c0_i32, %c0_i32_0 : i32, i32
  }
  func.func @transform_7(%arg0: i32) -> (i32, i32, i32) {
    %c0_i32 = arith.constant 0 : i32
    %c0_i32_0 = arith.constant 0 : i32
    %c0_i32_1 = arith.constant 0 : i32
    return %arg0, %c0_i32, %c0_i32_0 : i32, i32, i32
  }
}

</mosaic_0001>

<bundles_post_ra>
// kernel: tpu_custom_call.1
= control target key start
LH: loop header
LB: loop body
LE: loop exit
PB: predicated region body
PF: predicated region fallthrough
CT: control target
= control target key end

     0   :  { %12 = vsyncpa [#allocation3], 0  ;;  %s1269_s0 = inlined_call_operand.vmem [shape: f32[2,4,256], index: 0, kind: input, shape index: {}]   ;;  %s1270_s1 = inlined_call_operand.vmem [shape: bf16[3,8,4], index: 1, kind: input, shape index: {}]   ;;  %s1271_s2 = inlined_call_operand.vmem [shape: f32[8,1], index: 2, kind: input, shape index: {}]   ;;  %s1272_s3 = inlined_call_operand.vmem [shape: bf16[3,8,8], index: 3, kind: input, shape index: {}]   ;;  %s1273_s4 = inlined_call_operand.vmem [shape: f32[8,1], index: 4, kind: input, shape index: {}]   ;;  %s1274_s5 = inlined_call_operand.vmem [shape: bf16[8,4], index: 5, kind: input, shape index: {}]   ;;  %s1275_s6 = inlined_call_operand.vmem [shape: f32[8,1], index: 6, kind: input, shape index: {}]   ;;  %s1276_s7 = inlined_call_operand.hbm [shape: f32[2,8,256], index: 7, kind: output, shape index: {}]  }
   0x1   :  { %14 = vsyncpa [#allocation3 + $0x1], 0  ;;  %s1059_s24 = smov 0   ;;  %s1061_s25 = smov 0  }
   0x2   :  { %s1063_s26 = smov 0   ;;  %s1065_s27 = smov 0  }
   0x3 LB: > { %s1080_s28 = sadd.s32 4294967295, %s1012_s27   ;;  %s854_s29 = sadd.s32 4294967294, %s1012_s27   ;;  %s1012_s27 = sphi %s1065_s27, %s1282_s27   ;;  %s1008_s26 = sphi %s1063_s26, %s1281_s26   ;;  %s1004_s25 = sphi %s1061_s25, %s1280_s25   ;;  %s1000_s24 = sphi %s1059_s24, %s1279_s24  }
   0x4   : > { %s1084_s30 = sadd.s32 1, %s1012_s27   ;;  %s179_s8 = sadd.s32 1, %s1008_s26 }
   0x5   : > { %s176_s9 = ssub.s32 %s1012_s27, %s1084_s30  ;;  %p189_p0 = scmp.ne.s32.totalorder %s1008_s26, %s1004_s25 }
   0x6   : > { %p177_p1 = scmp.eq.s32.totalorder %s176_s9, 0  ;;  %p190_p2 = scmp.eq.s32.totalorder %s1080_s28, 1 }
   0x7   : > { %p195_p3 = scmp.ne.s32.totalorder %s1004_s25, %s1000_s24  ;;  %p196_p4 = scmp.eq.s32.totalorder %s854_s29, 1 }
   0x8   : > { %s1095_s10 = scalar_select %p177_p1, %s1008_s26, %s179_s8  }
   0x9   : > { %p1097_p5 = por %p190_p2, %p189_p0  ;;  %p1101_p6 = por %p196_p4, %p195_p3 }
   0xa   : > { %p857_p7 = scmp.ge.s32.totalorder %s1012_s27, 1  ;;  %p240_p8 = scmp.lt.s32.totalorder %s1012_s27, 3 }
   0xc   : > { %p241_p9 = pnand %p857_p7, %p240_p8 }
   0xd   : > { %p272_p10 = scmp.lt.s32.totalorder (!%p241_p9), %s1080_s28, 1  ;;  %s1015_s18 = smov (!%p241_p9), 1  }
   0xe   : > { %244 = sbr.rel (%p241_p9) target bundleno = 711 (0x2c7), region = 48  ;;  %s1016_s21 = smov (!%p241_p9), 127  }
   0xf   : > { %s269_s9 = sand.u32 (!%p241_p9), 1, %s1004_s25   ;;  %s1018_s22 = smov (!%p241_p9), [#allocation2]  }
  0x10   : > { %s781_s20 = scalar_lea.sflag (!%p241_p9), [#allocation3], %s269_s9 }
  0x13   : > { %v1014_v0 = vmov 0   ;;  %s273_s13 = scalar_select %p272_p10, %s1080_s28, 1  ;;  %vm365_vm0 = vcmask 1041408   ;;  %vm361_vm1 = vcmask 31744   ;;  %v863_v7 = vld [vmem:[%s1270_s1 + $0x4] sm:$0xf]  ;;  %v286_v9 = vlaneseq }
  0x14   : > { %404 = vmatprep.mubr.bf16.mxu0 %v1014_v0  ;;  %463 = vmatprep.mubr.bf16.mxu1 %v1014_v0  ;;  %v359_v8 = vld [vmem:[%s1271_s2] sm:$0xff]  ;;  %vm1017_vm3 = vmmov 1   ;;  %v866_v44 = vld [vmem:[%s1270_s1 + $0x8] sm:$0xf]  ;;  %vm558_vm13 = vcmask 1043456   ;;  %vm554_vm14 = vcmask 64512  }
  0x15   : > { %939 = vset.pattern.permute.xlu1 %v1014_v0  ;;  %950 = vset.pattern.permute.xlu0 %v1014_v0  ;;  %s884_s14 = sshll.u32 %s273_s13, 3  ;;  %v1134_v10 = vand.u32 127, %v286_v9  ;;  %v321_v14 = vshrl.u32 %v286_v9, 7  ;;  %v360_v38 = vld [vmem:[%s1270_s1] sm:$0xf]  ;;  %s858_s13 = sshll.u32 %s269_s9, 4 }
  0x16   : > { %s276_s17 = scalar_lea.vmem %s1269_s0, %s884_s14  ;;  %415 = vperm.xlu1 %939, %v359_v8   ;;  %v552_v9 = vld [vmem:[%s1273_s4] sm:$0xff]  ;;  %s885_s14 = sshll.u32 %s1080_s28, 8 }
  0x17   : > { %v280_v1 = vld [vmem:[%s276_s17] sm:$0xff]  ;;  %v288_v11 = vadd.s32 128, %v1134_v10  ;;  %v289_v12 = vadd.s32 4294967295, %v1134_v10  ;;  %v326_v15 = vsub.s32 4, %v321_v14  ;;  %v322_v17 = vsub.s32 0, %v321_v14  ;;  %s271_s15 = scalar_lea.vmem [#allocation2], %s858_s13  ;;  %s793_s19 = scalar_lea.hbm %s1276_s7, %s885_s14 }
  0x18   : > { %v282_v2 = vcombine.high %v280_v1, %v280_v1  ;;  %v284_v3 = vpack.c.bf16 %v280_v1, %v280_v1  ;;  %vm309_vm7 = vcmp.lt.s32.totalorder %v1134_v10, 1  ;;  %vm336_vm10 = vcmp.lt.s32.totalorder %v1134_v10, 127  ;;  %v553_v10 = vld [vmem:[%s1272_s3] sm:$0xf]  ;;  %s795_s16 = sshll.u32 %s271_s15, 4  ;;  %s956_s28 = sshll.u32 %s1018_s22, 4  ;;  %s796_s16 = int_to_ptr.vmem [resolvable:$true] %s795_s16  ;;  %s957_s28 = int_to_ptr.vmem [resolvable:$false] %s956_s28 }
  0x19   : > { %vm291_vm2 = vcmp.ge.s32.totalorder %v289_v12, 0  ;;  %v298_v13 = vadd.s32 1, %v288_v11  ;;  %v871_v11 = vld [vmem:[%s1272_s3 + $0x4] sm:$0xf]  ;;  %s958_s23 = scalar_lea.vmem %s957_s28, 512  ;;  %p959_p0 = scmp.lt.s32.totalorder %s796_s16, %s957_s28 }
  0x1a   : > { %v929_v4 = vpack.i.bf16 %v282_v2, %v280_v1  ;;  %v1116_v5 = vpack.c.bf16 %v282_v2, %v282_v2  ;;  %v1119_v6 = vsel %vm365_vm0, %v284_v3, 0  ;;  %vm318_vm4 = vmpackc.low %vm1017_vm3, %vm291_vm2  ;;  %v724_v12 = vld [vmem:[%s1275_s6] sm:$0xff] }
  0x1b   : > { %vm302_vm5 = vcmp.lt.s32.totalorder %v298_v13, 256  ;;  %v319_v16 = vsel %vm318_vm4, 65537, %v1014_v0  ;;  %v723_v13 = vld [vmem:[%s1274_s5] sm:$0xf] }
  0x1c   : > { %930 = vrot.lane.b32.xlu0 %v929_v4, %s1015_s18  ;;  %864 = vmatprep.subr.msk.bf16.mxu1 %vm365_vm0, %v1116_v5  ;;  %vm345_vm6 = vmpackc.low %vm302_vm5, %vm1017_vm3  ;;  %v1139_v18 = vrot.slane %v319_v16, %v326_v15  ;;  %v1141_v19 = vrot.slane %v319_v16, %v322_v17 }
  0x1d   : > { %446 = vmatpush1.bf16.msra.mxu1 %v1119_v6  ;;  %v346_v20 = vsel %vm345_vm6, 65537, %v1014_v0 }
  0x1e   : > { %vm329_vm8 = vcmp.ne.s16.totalorder %v1139_v18, 0  ;;  %v1146_v24 = vrot.slane %v346_v20, %v326_v15  ;;  %vm328_vm9 = vcmp.ne.s16.totalorder %v1141_v19, 0  ;;  %v1153_v27 = vrot.slane %v346_v20, %v322_v17  ;;  %v874_v19 = vld [vmem:[%s1272_s3 + $0x8] sm:$0xf] }
  0x20   : > { %935 = vrot.lane.b32.xlu0 %v929_v4, %s1016_s21  ;;  %865 = vmatmul.mubr.msk.bf16.vlgmr.msra.gmra.mxu1 %vm361_vm1, %v863_v7  ;;  %vm356_vm11 = vcmp.ne.s16.totalorder %v1146_v24, 0  ;;  %vm355_vm12 = vcmp.ne.s16.totalorder %v1153_v27, 0 }
  0x21   : > { %597 = vmatprep.mubr.bf16.mxu1 %v1014_v0 }
  0x8e   : > { %v931_v21 = vpop.permute.xlu0 %930 }
  0x8f   : > { %v933_v22 = vunpack.i.h.bf16 %v931_v21  ;;  %v932_v23 = vunpack.i.l.bf16 %v931_v21 }
  0x91   : > { %v310_v25 = vsel %vm309_vm7, %v932_v23, %v933_v22  ;;  %v311_v26 = vsel %vm309_vm7, %v933_v22, %v932_v23  ;;  %v416_v49 = vpop.permute.xlu1 %415 }
  0x92   : > { %v313_v28 = vpack.c.bf16 %v310_v25, %v310_v25  ;;  %v936_v29 = vpop.permute.xlu0 %935  ;;  %v312_v30 = vpack.c.bf16 %v311_v26, %v311_v26 }
  0x93   : > { %v938_v31 = vunpack.i.h.bf16 %v936_v29  ;;  %v937_v32 = vunpack.i.l.bf16 %v936_v29 }
  0x94   : > { %v331_v33 = vsel %vm329_vm8, %v313_v28, 0  ;;  %v330_v34 = vsel %vm328_vm9, %v312_v30, 0 }
  0x95   : > { %861 = vmatprep.subr.msk.bf16.mxu0 %vm365_vm0, %v331_v33  ;;  %v337_v35 = vsel %vm336_vm10, %v937_v32, %v938_v31  ;;  %v367_v36 = vsel %vm365_vm0, %v330_v34, 0  ;;  %v338_v37 = vsel %vm336_vm10, %v938_v31, %v937_v32 }
  0x96   : > { %387 = vmatpush1.bf16.msra.mxu0 %v367_v36  ;;  %v340_v39 = vpack.c.bf16 %v338_v37, %v338_v37  ;;  %v339_v40 = vpack.c.bf16 %v337_v35, %v337_v35 }
  0x98   : > { %v358_v41 = vsel %vm356_vm11, %v340_v39, 0  ;;  %v357_v42 = vsel %vm355_vm12, %v339_v40, 0 }
  0x99   : > { %862 = vmatmul.mubr.msk.bf16.vlgmr.msra.gmra.mxu0 %vm361_vm1, %v360_v38  ;;  %867 = vmatprep.subr.msk.bf16.mxu0 %vm365_vm0, %v358_v41  ;;  %v480_v43 = vsel %vm365_vm0, %v357_v42, 0 }
  0x9a   : > { %500 = vmatpush1.bf16.msra.mxu0 %v480_v43  ;;  %517 = vmatprep.mubr.bf16.mxu0 %v1014_v0 }
  0xa1   : > { %868 = vmatmul.mubr.msk.bf16.vlgmr.msra.gmra.mxu0 %vm361_vm1, %v866_v44 }
  0xa2   : > { %656 = vmatprep.mubr.bf16.mxu0 %v1014_v0 }
  0xe0   : > { %v465_v45 = vpop.f32.mrf.mxu1 }
  0xe2   : > { %v467_v46 = vpop.f32.mrf.mxu1 }
  0xe4   : > { %v469_v47 = vpop.f32.mrf.mxu1 }
  0xe6   : > { %v470_v48 = vpop.f32.mrf.mxu1 }
 0x159   : > { %v406_v50 = vpop.f32.mrf.mxu0 }
 0x15a   : > { %v418_v52 = vadd.f32 %v416_v49, %v406_v50 }
 0x15b   : > { %v408_v51 = vpop.f32.mrf.mxu0 }
 0x15c   : > { %v419_v54 = vadd.f32 %v416_v49, %v408_v51  ;;  %v472_v56 = vadd.f32 %v465_v45, %v418_v52 }
 0x15d   : > { %v410_v53 = vpop.f32.mrf.mxu0 }
 0x15e   : > { %v473_v58 = vadd.f32 %v467_v46, %v419_v54 }
 0x15f   : > { %v411_v55 = vpop.f32.mrf.mxu0 }
 0x161   : > { %v519_v57 = vpop.f32.mrf.mxu0 }
 0x162   : > { %v526_v59 = vadd.f32 %v519_v57, %v472_v56 }
 0x163   : > { %v521_v60 = vpop.f32.mrf.mxu0 }
 0x164   : > { %v528_v61 = vmax.f32 %v526_v59, 0.0  ;;  %v527_v62 = vadd.f32 %v521_v60, %v473_v58 }
 0x165   : > { %v523_v63 = vpop.f32.mrf.mxu0 }
 0x166   : > { %v529_v1 = vmax.f32 %v527_v62, 0.0  ;;  %v530_v3 = vpack.c.bf16 %v528_v61, %v528_v61 }
 0x167   : > { %v524_v2 = vpop.f32.mrf.mxu0 }
 0x168   : > { %v531_v4 = vpack.c.bf16 %v529_v1, %v529_v1  ;;  %v945_v7 = vpack.i.bf16 %v529_v1, %v528_v61  ;;  %v619_v8 = vsel %vm558_vm13, %v530_v3, 0 }
 0x16a   : > { %946 = vrot.lane.b32.xlu0 %v945_v7, %s1016_s21  ;;  %941 = vrot.lane.b32.xlu1 %v945_v7, %s1015_s18  ;;  %s952_s21 = scalar_lea.vmem %s796_s16, 256 }
 0x16b   : > { %872 = vmatprep.subr.msk.bf16.mxu0 %vm558_vm13, %v531_v4  ;;  %p953_p11 = scmp.ne.s32.totalorder %s796_s16, %s952_s21  ;;  %p960_p1 = scmp.lt.s32.totalorder %s958_s23, %s952_s21 }
 0x16c   : > { %639 = vmatpush1.bf16.msra.mxu0 %v619_v8 }
 0x16d   : > { %877 = vmatprep.subr.msk.bf16.mxu0 %vm365_vm0, %v1116_v5  ;;  %p954_p12 = pnand %p953_p11, %p1097_p5  ;;  %p961_p2 = por %p960_p1, %p959_p0 }
 0x16e   : > { %608 = vperm.xlu1 %939, %v552_v9   ;;  %727 = vperm.xlu0 %950, %v724_v12  }
 0x16f   : > { %873 = vmatmul.mubr.msk.bf16.vlgmr.msra.gmra.mxu0 %vm554_vm14, %v871_v11  ;;  %p955_p13 = pneg %p954_p12 }
 0x170   : > { %748 = vmatpush1.bf16.msra.mxu0 %v1119_v6  ;;  %765 = vmatprep.mubr.bf16.mxu0 %v1014_v0 }
 0x171   : > { %p962_p3 = pnand %p961_p2, %p955_p13 }
 0x177   : > { %878 = vmatmul.mubr.msk.bf16.vlgmr.msra.gmra.mxu0 %vm361_vm1, %v723_v13 }
 0x1dc   : > { %v947_v14 = vpop.permute.xlu0 %946  ;;  %v942_v5 = vpop.permute.xlu1 %941 }
 0x1dd   : > { %v949_v15 = vunpack.i.h.bf16 %v947_v14  ;;  %v948_v16 = vunpack.i.l.bf16 %v947_v14  ;;  %v944_v17 = vunpack.i.h.bf16 %v942_v5  ;;  %v943_v20 = vunpack.i.l.bf16 %v942_v5 }
 0x1df   : > { %v546_v21 = vsel %vm336_vm10, %v948_v16, %v949_v15  ;;  %v537_v6 = vsel %vm309_vm7, %v944_v17, %v943_v20  ;;  %v536_v22 = vsel %vm309_vm7, %v943_v20, %v944_v17  ;;  %v547_v23 = vsel %vm336_vm10, %v949_v15, %v948_v16 }
 0x1e0   : > { %v539_v25 = vpack.c.bf16 %v536_v22, %v536_v22  ;;  %v538_v26 = vpack.c.bf16 %v537_v6, %v537_v6  ;;  %v549_v28 = vpack.c.bf16 %v547_v23, %v547_v23  ;;  %v548_v29 = vpack.c.bf16 %v546_v21, %v546_v21 }
 0x1e2   : > { %v541_v30 = vsel %vm329_vm8, %v539_v25, 0  ;;  %v540_v31 = vsel %vm328_vm9, %v538_v26, 0  ;;  %v551_v33 = vsel %vm356_vm11, %v549_v28, 0  ;;  %v550_v34 = vsel %vm355_vm12, %v548_v29, 0 }
 0x1e3   : > { %869 = vmatprep.subr.msk.bf16.mxu1 %vm558_vm13, %v541_v30  ;;  %v560_v32 = vsel %vm558_vm13, %v540_v31, 0  ;;  %v673_v18 = vsel %vm558_vm13, %v550_v34, 0 }
 0x1e4   : > { %580 = vmatpush1.bf16.msra.mxu1 %v560_v32 }
 0x1e5   : > { %875 = vmatprep.subr.msk.bf16.mxu1 %vm558_vm13, %v551_v33 }
 0x1e7   : > { %870 = vmatmul.mubr.msk.bf16.vlgmr.msra.gmra.mxu1 %vm554_vm14, %v553_v10 }
 0x1e8   : > { %693 = vmatpush1.bf16.msra.mxu1 %v673_v18  ;;  %710 = vmatprep.mubr.bf16.mxu1 %v1014_v0 }
 0x1e9   : > { %v609_v42 = vpop.permute.xlu1 %608  ;;  %v728_v47 = vpop.permute.xlu0 %727 }
 0x1ef   : > { %876 = vmatmul.mubr.msk.bf16.vlgmr.msra.gmra.mxu1 %vm554_vm14, %v874_v19 }
 0x22f   : > { %v658_v24 = vpop.f32.mrf.mxu0 }
 0x231   : > { %v660_v35 = vpop.f32.mrf.mxu0 }
 0x233   : > { %v662_v27 = vpop.f32.mrf.mxu0 }
 0x235   : > { %v663_v36 = vpop.f32.mrf.mxu0 }
 0x237   : > { %v767_v37 = vpop.f32.mrf.mxu0 }
 0x238   : > { %v768_v52 = vadd.f32 %v767_v37, %v728_v47 }
 0x239   : > { %v769_v38 = vpop.f32.mrf.mxu0 }
 0x23a   : > { %v770_v59 = vadd.f32 %v769_v38, %v728_v47 }
 0x23b   : > { %v771_v39 = vpop.f32.mrf.mxu0 }
 0x23d   : > { %v772_v40 = vpop.f32.mrf.mxu0 }
 0x2a7   : > { %v599_v41 = vpop.f32.mrf.mxu1 }
 0x2a8   : > { %v611_v44 = vadd.f32 %v609_v42, %v599_v41 }
 0x2a9   : > { %v601_v43 = vpop.f32.mrf.mxu1 }
 0x2aa   : > { %v612_v45 = vadd.f32 %v609_v42, %v601_v43  ;;  %v665_v48 = vadd.f32 %v658_v24, %v611_v44 }
 0x2ab   : > { %v603_v0 = vpop.f32.mrf.mxu1 }
 0x2ac   : > { %v666_v50 = vadd.f32 %v660_v35, %v612_v45 }
 0x2ad   : > { %v604_v46 = vpop.f32.mrf.mxu1 }
 0x2af   : > { %v712_v49 = vpop.f32.mrf.mxu1 }
 0x2b0   : > { %v719_v51 = vadd.f32 %v712_v49, %v665_v48 }
 0x2b1   : > { %v714_v53 = vpop.f32.mrf.mxu1 }
 0x2b2   : > { %v721_v54 = vmax.f32 %v719_v51, 0.0  ;;  %v720_v55 = vadd.f32 %v714_v53, %v666_v50 }
 0x2b3   : > { %v716_v56 = vpop.f32.mrf.mxu1 }
 0x2b4   : > { %v774_v57 = vadd.f32 %v768_v52, %v721_v54  ;;  %v722_v58 = vmax.f32 %v720_v55, 0.0 }
 0x2b5   : > { %v717_v60 = vpop.f32.mrf.mxu1 }
 0x2b6   : > { %v776_v61 = vmax.f32 %v774_v57, 0.0  ;;  %v775_v62 = vadd.f32 %v770_v59, %v722_v58 }
 0x2b8   : > { %778 = vst [vmem:[%s271_s15] sm:$0xff] %v776_v61  ;;  %v777_v63 = vmax.f32 %v775_v62, 0.0 }
 0x2ba   : > { %779 = vst [vmem:[%s271_s15 + $0x8] sm:$0xff] %v777_v63 }
 0x2bb   : > { %965 = shalt.err (!%p962_p3)
}
 0x2bc   : > { %s966_s29 = scalar_lea.hbm %s793_s19, 256  ;;  %s970_s13 = scalar_lea.hbm %s1276_s7, 512 }
 0x2bd   : > { %p967_p4 = scmp.ne.s32.totalorder %s793_s19, %s966_s29  ;;  %p971_p9 = scmp.lt.s32.totalorder %s793_s19, %s1276_s7 }
 0x2be   : > { %p972_p10 = scmp.lt.s32.totalorder %s970_s13, %s966_s29 }
 0x2bf   : > { %p968_p7 = pnand %p967_p4, %p1097_p5 }
 0x2c0   : > { %p973_p11 = por %p972_p10, %p971_p9 }
 0x2c1   : > { %p969_p8 = pneg %p968_p7 }
 0x2c3   : > { %p974_p12 = pnand %p973_p11, %p969_p8 }
 0x2c5   : > { %977 = shalt.err (!%p974_p12)
}
 0x2c6   : > { %886 = dma.vmem_to_hbm [thread:$0]  (%p1097_p5), %s796_s16, 256, %s793_s19, %s781_s20  }
 0x2c7 PF: > { %p892_p13 = scmp.ge.s32.totalorder %s1012_s27, 2  ;;  %s807_s17 = sand.u32 1, %s1000_s24  }
 0x2c8   : > { %s808_s18 = scalar_lea.sflag [#allocation3], %s807_s17 }
 0x2c9   : > { %p889_p0 = pnand %p892_p13, %p1101_p6 }
 0x2cb   : > { %p890_p1 = pneg %p889_p0 }
 0x2cd   : > { %995 = dma.done.wait (%p890_p1), %s808_s18, 256  }
 0x2ce   : > { %997 = vsyncadd (%p890_p1), %s808_s18, 4294967040  ;;  %p17_p2 = scmp.ge.s32.totalorder %s1084_s30, 4   ;;  %s1279_s24 = smov %s1004_s25 }
 0x2cf   : > { %s1280_s25 = smov %s1008_s26  ;;  %s1281_s26 = smov %s1095_s10 }
 0x2d0   : > { %s1282_s27 = smov %s1084_s30  ;;  %19 = sbr.rel (!%p17_p2) target bundleno = 3 (0x3), region = 87 }
 0x2d5   :  { %813 = vsyncpa [#allocation3], 1 }
 0x2d6   :  { %815 = vsyncpa [#allocation3 + $0x1], 1 }

</bundles_post_ra>
